<compile_context>
chip_gen: v6e
topology: v6e:2x2x1
jax: 0.10.0
libtpu: 0.0.40
codegen_flags: <defaults>
</compile_context>

<pallas_src>
import math
from functools import partial

import jax
import jax.numpy as jnp
from jax.experimental import pallas as pl
from jax.experimental.pallas import tpu as pltpu


def _round_up(x, m):
    return ((x + m - 1) // m) * m


def _cdiv(a, b):
    return (a + b - 1) // b


def _gcn_kernel(has_bias, mxu_dtype, *refs):
    """One grid step processes BT graphs.

    refs (bias):    adj (BT,N,N), afm (BT,N,Fin), w (Fin,Fout), b (1,Fout), out (BT,N,Fout)
    refs (no bias): adj, afm, w, out
    """
    if has_bias:
        adj_ref, afm_ref, w_ref, b_ref, out_ref = refs
    else:
        adj_ref, afm_ref, w_ref, out_ref = refs
        b_ref = None

    bt, n, fin = afm_ref.shape
    fout = w_ref.shape[-1]

    # (1) Dense projection as ONE large matmul over all BT*N rows:
    #     (BT*N, Fin) @ (Fin, Fout), low-precision operands, f32 accumulation.
    x = afm_ref[...].reshape(bt * n, fin).astype(mxu_dtype)
    w = w_ref[...].astype(mxu_dtype)
    xw = jnp.dot(x, w, preferred_element_type=jnp.float32)          # (BT*N, Fout) f32

    # (2) Per-graph (block-diagonal) adjacency multiply:  A @ (X W).
    xw = xw.reshape(bt, n, fout).astype(mxu_dtype)
    adj = adj_ref[...].astype(mxu_dtype)
    out = jnp.einsum("bij,bjf->bif", adj, xw,
                     preferred_element_type=jnp.float32)            # (BT, N, Fout) f32

    # Epilogue in f32; bias is a lane-dense (1, Fout) row.
    if has_bias:
        out = out + b_ref[...][None]                                 # (1,1,Fout) broadcast
    out_ref[...] = out.astype(out_ref.dtype)


def graph_convolution(adjs, afms, weight, bias=None, *, block_b=None, use_bf16=True):
    """Pallas implementation of GraphConvolution.forward.

    adjs:   (B, N, N) float32
    afms:   (B, N, Fin) float32
    weight: (Fin, Fout) float32
    bias:   (Fout,) float32 or None
    returns (B, N, Fout) float32
    """
    B, N, N2 = adjs.shape
    assert N == N2
    Fin = afms.shape[-1]
    Fout = weight.shape[-1]
    assert afms.shape == (B, N, Fin)
    assert weight.shape == (Fin, Fout)

    f32 = jnp.float32
    adjs = adjs.astype(f32)
    afms = afms.astype(f32)
    weight = weight.astype(f32)

    # Layout padding: lane dims (Fin/Fout) -> x128 for unmasked vld/vst,
    # sublane dim (N) -> x8 so the in-kernel reshape is layout-preserving.
    n_p = _round_up(N, 8)
    fin_p = _round_up(Fin, 128)
    fout_p = _round_up(Fout, 128)

    # Batch tile: amortize ~0.35us/grid-step overhead and fill the MXU M dim.
    def tile_bytes(bt):
        io = bt * n_p * (n_p + fin_p + fout_p)        # adj + afm + out per step
        resident = fin_p * fout_p + fout_p            # weight + bias
        return 4 * (2 * io + 2 * resident)            # f32, double-buffered

    if block_b is None:
        block_b = max(1, min(B, _cdiv(512, n_p)))     # ~512 rows per projection
        budget = 24 * 1024 * 1024                     # safe under v7x 64 MiB VMEM
        while block_b > 1 and tile_bytes(block_b) > budget:
            block_b = (block_b + 1) // 2
    block_b = max(1, min(block_b, B))
    # TODO(synk): on v7x (2 TCs/chip), prefer block_b giving >=2 grid steps when
    # B*N is large; at these tiny shapes that would shrink the MXU M dimension.

    b_p = _round_up(B, block_b)
    adjs_p = jnp.pad(adjs, ((0, b_p - B), (0, n_p - N), (0, n_p - N)))
    afms_p = jnp.pad(afms, ((0, b_p - B), (0, n_p - N), (0, fin_p - Fin)))
    weight_p = jnp.pad(weight, ((0, fin_p - Fin), (0, fout_p - Fout)))

    has_bias = bias is not None
    args = [adjs_p, afms_p, weight_p]
    in_specs = [
        pl.BlockSpec((block_b, n_p, n_p), lambda b: (b, 0, 0)),
        pl.BlockSpec((block_b, n_p, fin_p), lambda b: (b, 0, 0)),
        pl.BlockSpec((fin_p, fout_p), lambda b: (0, 0)),
    ]
    if has_bias:
        bias_p = jnp.pad(bias.astype(f32), (0, fout_p - Fout)).reshape(1, fout_p)
        args.append(bias_p)
        in_specs.append(pl.BlockSpec((1, fout_p), lambda b: (0, 0)))

    mxu_dtype = jnp.bfloat16 if use_bf16 else jnp.float32
    kernel = partial(_gcn_kernel, has_bias, mxu_dtype)

    grid = (b_p // block_b,)

    flops = 2 * B * N * Fin * Fout + 2 * B * N * N * Fout
    bytes_accessed = 4 * (B * N * N + B * N * Fin + Fin * Fout
                          + B * N * Fout + (Fout if has_bias else 0))
    cost = pl.CostEstimate(flops=int(flops), transcendentals=0,
                           bytes_accessed=int(bytes_accessed))

    vmem_limit = int(min(64 * 1024 * 1024,
                         max(2 * tile_bytes(block_b), 16 * 1024 * 1024)))

    out_p = pl.pallas_call(
        kernel,
        out_shape=jax.ShapeDtypeStruct((b_p, n_p, fout_p), f32),
        grid_spec=pltpu.PrefetchScalarGridSpec(
            num_scalar_prefetch=0,
            grid=grid,
            in_specs=in_specs,
            out_specs=pl.BlockSpec((block_b, n_p, fout_p), lambda b: (b, 0, 0)),
        ),
        compiler_params=pltpu.CompilerParams(
            dimension_semantics=("parallel",),
            vmem_limit_bytes=vmem_limit,
        ),
        cost_estimate=cost,
    )(*args)

    return out_p[:B, :N, :Fout]


def init_params(key, in_features, out_features, use_bias=False):
    """Deterministic init matching reset_parameters(): uniform(-stdv, stdv)."""
    stdv = 1.0 / math.sqrt(out_features)
    k_w, k_b = jax.random.split(key)
    weight = jax.random.uniform(
        k_w, (in_features, out_features), jnp.float32, minval=-stdv, maxval=stdv
    )
    bias = None
    if use_bias:
        bias = jax.random.uniform(
            k_b, (out_features,), jnp.float32, minval=-stdv, maxval=stdv
        )
    return weight, bias


if __name__ == "__main__":
    # Small shapes consistent with the module's forward:
    #   B graphs, N atoms per graph, Fin input atom-features, Fout output features.
    B, N, Fin, Fout = 2, 16, 32, 32

    key = jax.random.PRNGKey(0)
    k_adj, k_afm, k_param = jax.random.split(key, 3)

    adjs = jax.random.uniform(k_adj, (B, N, N), jnp.float32)
    afms = jax.random.normal(k_afm, (B, N, Fin), jnp.float32)
    weight, bias = init_params(k_param, Fin, Fout, use_bias=True)

    # Reference (same math as the PyTorch forward), in plain JAX f32.
    support = jnp.einsum("bij,bjf->bif", adjs, afms)
    ref = jnp.einsum("bif,fo->bio", support, weight)
    ref_b = ref + bias[None, None, :]

    # f32 MXU path: matches the reference tightly (only reassociation error).
    out_f32 = jax.block_until_ready(
        graph_convolution(adjs, afms, weight, None, use_bf16=False))
    assert out_f32.shape == (B, N, Fout)
    assert jnp.allclose(out_f32, ref, atol=1e-4, rtol=1e-4)

    # Default path: bf16-fed MXU, f32 accumulation (per-generation perf guidance).
    out_bf16 = jax.block_until_ready(graph_convolution(adjs, afms, weight, None))
    assert out_bf16.shape == (B, N, Fout)
    assert jnp.allclose(out_bf16, ref, atol=5e-2, rtol=5e-2)

    # Bias path (module supports bias=True).
    out_bias = jax.block_until_ready(graph_convolution(adjs, afms, weight, bias))
    assert out_bias.shape == (B, N, Fout)
    assert jnp.allclose(out_bias, ref_b, atol=5e-2, rtol=5e-2)

    print("KERNEL_OK")
</pallas_src>

<mosaic_0001>
module attributes {stable_mosaic.version = 11 : i64} {
  func.func @_gcn_kernel(%arg0: i32, %arg1: memref<2x16x16xf32, #tpu.memory_space<vmem>>, %arg2: memref<2x16x128xf32, #tpu.memory_space<vmem>>, %arg3: memref<128x128xf32, #tpu.memory_space<vmem>>, %arg4: memref<2x16x128xf32, #tpu.memory_space<vmem>>) attributes {dimension_semantics = [#tpu.dimension_semantics<parallel>], iteration_bounds = array<i64: 1>, scalar_prefetch = 0 : i64, scratch_operands = 0 : i64, tpu.core_type = #tpu.core_type<tc>, window_params = [{transform_indices = @transform_0, window_bounds = array<i64: 2, 16, 16>}, {transform_indices = @transform_1, window_bounds = array<i64: 2, 16, 128>}, {pipeline_mode = #tpu.pipeline_mode<synchronous>, transform_indices = @transform_2, window_bounds = array<i64: 128, 128>}, {transform_indices = @transform_3, window_bounds = array<i64: 2, 16, 128>}]} {
    %c0 = arith.constant 0 : index
    %c0_0 = arith.constant 0 : index
    %c0_1 = arith.constant 0 : index
    %0 = vector.load %arg2[%c0, %c0_0, %c0_1] : memref<2x16x128xf32, #tpu.memory_space<vmem>>, vector<2x16x128xf32>
    %1 = vector.shape_cast %0 : vector<2x16x128xf32> to vector<32x128xf32>
    %c0_2 = arith.constant 0 : index
    %c0_3 = arith.constant 0 : index
    %2 = vector.load %arg3[%c0_2, %c0_3] : memref<128x128xf32, #tpu.memory_space<vmem>>, vector<128x128xf32>
    %cst = arith.constant dense<0.000000e+00> : vector<32x128xf32>
    %3 = tpu.matmul %1, %2, %cst {dimension_numbers = #tpu.dot_dimension_numbers<[1], [0], [0], [1], [0, 0, 1, 1], [], []>} : vector<32x128xf32>, vector<128x128xf32>, vector<32x128xf32> -> vector<32x128xf32>
    %4 = vector.shape_cast %3 : vector<32x128xf32> to vector<2x16x128xf32>
    %c0_4 = arith.constant 0 : index
    %c0_5 = arith.constant 0 : index
    %c0_6 = arith.constant 0 : index
    %5 = vector.load %arg1[%c0_4, %c0_5, %c0_6] : memref<2x16x16xf32, #tpu.memory_space<vmem>>, vector<2x16x16xf32>
    "tpu.trace_start"() <{level = 10 : i32, message = "bij,bjf->bif"}> : () -> ()
    %cst_7 = arith.constant dense<0.000000e+00> : vector<2x16x128xf32>
    %6 = tpu.matmul %5, %4, %cst_7 {dimension_numbers = #tpu.dot_dimension_numbers<[2], [1], [1], [2], [0, 0, 0, 1, 1, 2], [0], [0]>} : vector<2x16x16xf32>, vector<2x16x128xf32>, vector<2x16x128xf32> -> vector<2x16x128xf32>
    "tpu.trace_stop"() : () -> ()
    %c0_8 = arith.constant 0 : index
    %c0_9 = arith.constant 0 : index
    %c0_10 = arith.constant 0 : index
    %7 = vector.load %arg4[%c0_8, %c0_9, %c0_10] : memref<2x16x128xf32, #tpu.memory_space<vmem>>, vector<2x16x128xf32>
    tpu.vector_store %arg4[%c0_8, %c0_9, %c0_10], %6 {strides = array<i32>} : memref<2x16x128xf32, #tpu.memory_space<vmem>>, vector<2x16x128xf32>,
    return
  }
  func.func @transform_0(%arg0: i32) -> (i32, i32, i32) {
    %c0_i32 = arith.constant 0 : i32
    %c0_i32_0 = arith.constant 0 : i32
    %c0_i32_1 = arith.constant 0 : i32
    return %arg0, %c0_i32, %c0_i32_0 : i32, i32, i32
  }
  func.func @transform_1(%arg0: i32) -> (i32, i32, i32) {
    %c0_i32 = arith.constant 0 : i32
    %c0_i32_0 = arith.constant 0 : i32
    %c0_i32_1 = arith.constant 0 : i32
    return %arg0, %c0_i32, %c0_i32_0 : i32, i32, i32
  }
  func.func @transform_2(%arg0: i32) -> (i32, i32) {
    %c0_i32 = arith.constant 0 : i32
    %c0_i32_0 = arith.constant 0 : i32
    %c0_i32_1 = arith.constant 0 : i32
    return %c0_i32, %c0_i32_0 : i32, i32
  }
  func.func @transform_3(%arg0: i32) -> (i32, i32, i32) {
    %c0_i32 = arith.constant 0 : i32
    %c0_i32_0 = arith.constant 0 : i32
    %c0_i32_1 = arith.constant 0 : i32
    return %arg0, %c0_i32, %c0_i32_0 : i32, i32, i32
  }
}

</mosaic_0001>

<bundles_post_ra>
// kernel: tpu_custom_call.1
= control target key start
LH: loop header
LB: loop body
LE: loop exit
PB: predicated region body
PF: predicated region fallthrough
CT: control target
= control target key end

     0   :  { %8 = vsyncpa [#allocation3], 0  ;;  %s580_s0 = inlined_call_operand.hbm [shape: f32[2,16,16], index: 0, kind: input, shape index: {}]   ;;  %s581_s1 = inlined_call_operand.hbm [shape: f32[2,16,128], index: 1, kind: input, shape index: {}]   ;;  %s582_s2 = inlined_call_operand.hbm [shape: f32[128,128], index: 2, kind: input, shape index: {}]   ;;  %s583_s3 = inlined_call_operand.hbm [shape: f32[2,16,128], index: 3, kind: output, shape index: {}]  }
   0x1   :  { %9 = vsyncpa [#allocation6], 0 }
   0x2   :  { %10 = vsyncpa [#allocation4], 0  ;;  %s526_s12 = smov [#allocation5]   ;;  %s527_s14 = smov [#allocation2]  }
   0x3   :  { %s28_s13 = sshll.u32 %s526_s12, 4  ;;  %s16_s15 = sshll.u32 %s527_s14, 4  ;;  %s29_s13 = int_to_ptr.vmem [resolvable:$true] %s28_s13  ;;  %s17_s15 = int_to_ptr.vmem [resolvable:$true] %s16_s15 }
   0x4   :  { %s448_s16 = scalar_lea.vmem %s29_s13, 512  ;;  %p453_p1 = scmp.lt.s32.totalorder %s29_s13, %s29_s13 }
   0x5   :  { %p449_p0 = scmp.ne.s32.totalorder %s29_s13, %s448_s16  ;;  %p454_p2 = scmp.lt.s32.totalorder %s448_s16, %s448_s16 }
   0x7   :  { %p455_p3 = por %p454_p2, %p453_p1 }
   0x9   :  { %p456_p4 = pnand %p455_p3, %p449_p0 }
   0xb   :  { %459 = shalt.err (!%p456_p4)
}
   0xc   :  { %s528_s17 = smov 128   ;;  %s529_s18 = smov 8  }
   0xd   :  { %34 = dma.hbm_to_vmem [thread:$0]  %s581_s1, 512, %s29_s13, [#allocation6], %s528_s17, %s528_s17, %s529_s18  }
   0xe   :  { %s468_s21 = scalar_lea.vmem %s17_s15, 512  ;;  %p473_p6 = scmp.lt.s32.totalorder %s17_s15, %s17_s15 }
   0xf   :  { %p469_p5 = scmp.ne.s32.totalorder %s17_s15, %s468_s21  ;;  %p474_p7 = scmp.lt.s32.totalorder %s468_s21, %s468_s21 }
  0x11   :  { %p475_p8 = por %p474_p7, %p473_p6 }
  0x13   :  { %p476_p9 = pnand %p475_p8, %p469_p5 }
  0x15   :  { %479 = shalt.err (!%p476_p9)
}
  0x16   :  { %22 = dma.hbm_to_vmem [thread:$0]  %s580_s0, 512, %s17_s15, [#allocation3], %s528_s17, %s528_s17, %s529_s18  }
  0x17   :  { %s530_s24 = smov [#allocation7]  }
  0x18   :  { %s40_s25 = sshll.u32 %s530_s24, 4  ;;  %s41_s25 = int_to_ptr.vmem [resolvable:$true] %s40_s25 }
  0x19   :  { %s488_s26 = scalar_lea.vmem %s41_s25, 2048  ;;  %p493_p11 = scmp.lt.s32.totalorder %s41_s25, %s41_s25 }
  0x1a   :  { %p489_p10 = scmp.ne.s32.totalorder %s41_s25, %s488_s26  ;;  %p494_p12 = scmp.lt.s32.totalorder %s488_s26, %s488_s26 }
  0x1c   :  { %p495_p13 = por %p494_p12, %p493_p11 }
  0x1e   :  { %p496_p0 = pnand %p495_p13, %p489_p10 }
  0x20   :  { %499 = shalt.err (!%p496_p0)
}
  0x21   :  { %46 = dma.hbm_to_vmem [thread:$0]  %s582_s2, 2048, %s41_s25, [#allocation6], %s528_s17, %s528_s17, %s529_s18  }
  0x22   :  { %520 = dma.done.wait [#allocation3], 512  }
  0x23   :  { %521 = vsyncadd [#allocation3], 4294966784 }
  0x24   :  { %522 = dma.done.wait [#allocation6], 2560  }
  0x25   :  { %523 = vsyncadd [#allocation6], 4294964736  ;;  %v75_v0 = vld [vmem:[#allocation7 + $0x78] sm:$0xff]  ;;  %v74_v1 = vld [vmem:[#allocation7 + $0x70] sm:$0xff]  ;;  %vm165_vm0 = vcmask 130048   ;;  %s531_s0 = smov [#allocation8]  }
  0x26   :  { %382 = vmatprep.subr.mxu0 %v75_v0  ;;  %v73_v2 = vld [vmem:[#allocation7 + $0x68] sm:$0xff]  ;;  %v72_v3 = vld [vmem:[#allocation7 + $0x60] sm:$0xff]  ;;  %v71_v5 = vld [vmem:[#allocation7 + $0x58] sm:$0xff]  ;;  %s337_s2 = sshll.u32 %s531_s0, 4  ;;  %s338_s2 = int_to_ptr.vmem [resolvable:$true] %s337_s2 }
  0x27   :  { %383 = vmatpush3.msra.mxu0 %v75_v0  ;;  %v56_v4 = vld [vmem:[#allocation5] sm:$0xff]  ;;  %v70_v6 = vld [vmem:[#allocation7 + $0x50] sm:$0xff]  ;;  %v69_v7 = vld [vmem:[#allocation7 + $0x48] sm:$0xff]  ;;  %s500_s28 = scalar_lea.vmem %s338_s2, 512  ;;  %p505_p2 = scmp.lt.s32.totalorder %s338_s2, %s338_s2 }
  0x28   :  { %384 = vmatprep.subr.mxu0 %v74_v1  ;;  %414 = vmatprep.mubr.f32.mxu0 %v56_v4  ;;  %v68_v8 = vld [vmem:[#allocation7 + $0x40] sm:$0xff]  ;;  %v67_v9 = vld [vmem:[#allocation7 + $0x38] sm:$0xff]  ;;  %v66_v10 = vld [vmem:[#allocation7 + $0x30] sm:$0xff]  ;;  %p501_p1 = scmp.ne.s32.totalorder %s338_s2, %s500_s28  ;;  %p506_p3 = scmp.lt.s32.totalorder %s500_s28, %s500_s28 }
  0x29   :  { %385 = vmatpush3.msra.mxu0 %v74_v1  ;;  %v65_v11 = vld [vmem:[#allocation7 + $0x28] sm:$0xff]  ;;  %v64_v12 = vld [vmem:[#allocation7 + $0x20] sm:$0xff]  ;;  %v63_v13 = vld [vmem:[#allocation7 + $0x18] sm:$0xff] }
  0x2a   :  { %386 = vmatprep.subr.mxu0 %v73_v2  ;;  %v62_v14 = vld [vmem:[#allocation7 + $0x10] sm:$0xff]  ;;  %v61_v15 = vld [vmem:[#allocation7 + $0x8] sm:$0xff]  ;;  %v60_v16 = vld [vmem:[#allocation7] sm:$0xff]  ;;  %p507_p4 = por %p506_p3, %p505_p2 }
  0x2b   :  { %387 = vmatpush3.msra.mxu0 %v73_v2  ;;  %v57_v17 = vld [vmem:[#allocation5 + $0x8] sm:$0xff]  ;;  %v58_v18 = vld [vmem:[#allocation5 + $0x10] sm:$0xff]  ;;  %v59_v19 = vld [vmem:[#allocation5 + $0x18] sm:$0xff] }
  0x2c   :  { %388 = vmatprep.subr.mxu0 %v72_v3  ;;  %v161_v20 = vld [vmem:[#allocation2] sm:$0xff]  ;;  %v162_v23 = vld [vmem:[#allocation2 + $0x8] sm:$0xff]  ;;  %v163_v24 = vld [vmem:[#allocation2 + $0x10] sm:$0xff]  ;;  %p508_p5 = pnand %p507_p4, %p501_p1 }
  0x2d   :  { %389 = vmatpush3.msra.mxu0 %v72_v3  ;;  %424 = vmatprep.mubr.msk.f32.mxu1 %vm165_vm0, %v161_v20  ;;  %v164_v27 = vld [vmem:[#allocation2 + $0x18] sm:$0xff] }
  0x2e   :  { %390 = vmatprep.subr.mxu0 %v71_v5 }
  0x2f   :  { %391 = vmatpush3.msra.mxu0 %v71_v5 }
  0x30   :  { %392 = vmatprep.subr.mxu0 %v70_v6 }
  0x31   :  { %393 = vmatpush3.msra.mxu0 %v70_v6 }
  0x32   :  { %394 = vmatprep.subr.mxu0 %v69_v7 }
  0x33   :  { %395 = vmatpush3.msra.mxu0 %v69_v7 }
  0x34   :  { %396 = vmatprep.subr.mxu0 %v68_v8 }
  0x35   :  { %397 = vmatpush3.msra.mxu0 %v68_v8 }
  0x36   :  { %398 = vmatprep.subr.mxu0 %v67_v9 }
  0x37   :  { %399 = vmatpush3.msra.mxu0 %v67_v9 }
  0x38   :  { %400 = vmatprep.subr.mxu0 %v66_v10 }
  0x39   :  { %401 = vmatpush3.msra.mxu0 %v66_v10 }
  0x3a   :  { %402 = vmatprep.subr.mxu0 %v65_v11 }
  0x3b   :  { %403 = vmatpush3.msra.mxu0 %v65_v11 }
  0x3c   :  { %404 = vmatprep.subr.mxu0 %v64_v12 }
  0x3d   :  { %405 = vmatpush3.msra.mxu0 %v64_v12 }
  0x3e   :  { %406 = vmatprep.subr.mxu0 %v63_v13 }
  0x3f   :  { %407 = vmatpush3.msra.mxu0 %v63_v13 }
  0x40   :  { %408 = vmatprep.subr.mxu0 %v62_v14 }
  0x41   :  { %409 = vmatpush3.msra.mxu0 %v62_v14 }
  0x42   :  { %410 = vmatprep.subr.mxu0 %v61_v15 }
  0x43   :  { %411 = vmatpush3.msra.mxu0 %v61_v15 }
  0x44   :  { %412 = vmatprep.subr.mxu0 %v60_v16 }
  0x45   :  { %413 = vmatpush3.msra.mxu0 %v60_v16 }
  0x46   :  { %415 = vmatmul.mubr.f32.vlgmr.msra.gmra.mxu0 %v57_v17 }
  0x47   :  { %417 = vmatprep.mubr.f32.mxu0 %v58_v18 }
  0x4a   :  { %418 = vmatmul.mubr.f32.gmra.mxu0 %v59_v19 }
 0x106   :  { %v416_v21 = vpop.f32.mrf.mxu0 }
 0x107   :  { %420 = vmatprep.subr.mxu1 %v416_v21 }
 0x108   :  { %v142_v22 = vpop.f32.mrf.mxu0  ;;  %421 = vmatpush3.msra.mxu1 %v416_v21 }
 0x109   :  { %422 = vmatprep.subr.mxu1 %v142_v22 }
 0x10a   :  { %v419_v25 = vpop.f32.mrf.mxu0  ;;  %423 = vmatpush3.msra.mxu1 %v142_v22 }
 0x10b   :  { %425 = vmatmul.mubr.msk.f32.vlgmr.msra.gmra.mxu1 %vm165_vm0, %v162_v23  ;;  %427 = vmatprep.subr.mxu1 %v419_v25 }
 0x10c   :  { %v152_v26 = vpop.f32.mrf.mxu0  ;;  %428 = vmatpush3.msra.mxu1 %v419_v25  ;;  %431 = vmatprep.mubr.msk.f32.mxu1 %vm165_vm0, %v163_v24 }
 0x10d   :  { %429 = vmatprep.subr.mxu1 %v152_v26 }
 0x10e   :  { %430 = vmatpush3.msra.mxu1 %v152_v26 }
 0x10f   :  { %432 = vmatmul.mubr.msk.f32.vlgmr.msra.gmra.mxu1 %vm165_vm0, %v164_v27 }
 0x1cb   :  { %v426_v28 = vpop.f32.mrf.mxu1 }
 0x1cc   :  { %329 = vst [vmem:[#allocation8 + $0x8] sm:$0xff] %v426_v28 }
 0x1cd   :  { %v238_v29 = vpop.f32.mrf.mxu1 }
 0x1ce   :  { %328 = vst [vmem:[#allocation8] sm:$0xff] %v238_v29 }
 0x1cf   :  { %v433_v30 = vpop.f32.mrf.mxu1 }
 0x1d0   :  { %331 = vst [vmem:[#allocation8 + $0x18] sm:$0xff] %v433_v30 }
 0x1d1   :  { %v319_v31 = vpop.f32.mrf.mxu1 }
 0x1d2   :  { %330 = vst [vmem:[#allocation8 + $0x10] sm:$0xff] %v319_v31 }
 0x1d3   :  { %511 = shalt.err (!%p508_p5)
}
 0x1d4   :  { %343 = dma.vmem_to_hbm [thread:$0]  %s338_s2, 512, %s583_s3, [#allocation4], %s528_s17, %s528_s17, %s529_s18  }
 0x1d5   :  { %524 = dma.done.wait [#allocation4], 512  }
 0x1d6   :  { %525 = vsyncadd [#allocation4], 4294966784 }
 0x1d7   :  { %347 = vsyncpa [#allocation3], 1 }
 0x1d8   :  { %348 = vsyncpa [#allocation6], 1 }
 0x1d9   :  { %349 = vsyncpa [#allocation4], 1 }

</bundles_post_ra>
